<compile_context>
chip_gen: v5e
topology: v5e:2x2
jax: 0.10.0
libtpu: 0.0.40
codegen_flags: <defaults>
</compile_context>

<pallas_src>
import functools

import jax
import jax.numpy as jnp
from jax.experimental import pallas as pl
from jax.experimental.pallas import tpu as pltpu

EPS = 1e-5
_MIB = 1024 * 1024


# --------------------------------------------------------------------------
# Kernels: x_ref is an (nb, C, T) tile; reduce over C (axis=1, sublanes).
# Statistics are per-(batch-row, lane), so padded tail lanes / rows only
# produce garbage that the masked writeback drops.
# --------------------------------------------------------------------------
def _biasfree_ln_kernel(x_ref, w_ref, o_ref):
    x = x_ref[...].astype(jnp.float32)
    mu = jnp.mean(x, axis=1, keepdims=True)              # (nb, 1, T)
    xc = x - mu
    var = jnp.mean(xc * xc, axis=1, keepdims=True)       # (nb, 1, T)
    inv = jax.lax.rsqrt(var + EPS)
    # BiasFree normalizes x (NOT x - mu); var is still computed about the mean.
    o_ref[...] = (x * inv * w_ref[...]).astype(o_ref.dtype)


def _withbias_ln_kernel(x_ref, w_ref, b_ref, o_ref):
    x = x_ref[...].astype(jnp.float32)
    mu = jnp.mean(x, axis=1, keepdims=True)
    xc = x - mu
    var = jnp.mean(xc * xc, axis=1, keepdims=True)
    inv = jax.lax.rsqrt(var + EPS)
    o_ref[...] = (xc * inv * w_ref[...] + b_ref[...]).astype(o_ref.dtype)


# --------------------------------------------------------------------------
# Block planning (all static / trace-time Python).
# --------------------------------------------------------------------------
def _round_up(x, m):
    return -(-x // m) * m


def _vmem_budget():
    """Generation-aware (vmem_limit_bytes, target_block_bytes, min_programs)."""
    try:
        cap = int(pltpu.get_tpu_info().vmem_capacity_bytes)
    except Exception:
        cap = 128 * _MIB
    if cap >= 96 * _MIB:
        # v5e / v6e: 128 MiB physical VMEM, 1 TensorCore per chip.
        vmem_limit = 64 * _MIB
        min_programs = 1
    else:
        # v7x: 64 MiB physical VMEM, 2 TensorCores per chip.
        vmem_limit = 44 * _MIB
        min_programs = 4
    # Live VMEM ~ 2*(in_block + out_block) + params; keep ~4 MiB slack.
    target_block = min(8 * _MIB, (vmem_limit - 4 * _MIB) // 4)
    return vmem_limit, target_block, min_programs


def _plan_blocks(B, C, HW, itemsize):
    """Pick (nb, t, vmem_limit): batch rows per block and lane tile width."""
    vmem_limit, target, min_programs = _vmem_budget()
    hw_pad = _round_up(HW, 128)

    # Pack multiple batch rows per block when a single image is small.
    per_image = C * hw_pad * itemsize
    if per_image >= target:
        nb = 1
    else:
        nb = max(1, min(B, target // max(1, per_image)))
        while nb > 1 and B % nb != 0:   # keep nb a divisor of B (no ragged tail)
            nb -= 1

    # Lane tile: a multiple of 128 that near-divides the 128-padded extent so
    # the tail tile is not mostly padding.
    if HW <= 128:
        t = HW                          # full extent is always a legal block dim
    else:
        per_col = nb * C * itemsize     # bytes per lane column of one block
        t_target = max(128, (target // max(1, per_col)) // 128 * 128)
        n_tiles = max(1, -(-hw_pad // t_target))
        t = min(hw_pad, _round_up(-(-HW // n_tiles), 128))

    # v7x: make sure both TensorCores get work when the data allows it.
    def _nprog(nb_, t_):
        return (-(-B // nb_)) * (-(-HW // t_))

    while _nprog(nb, t) < min_programs and (nb > 1 or t > 128):
        if nb > 1:
            nb = max(1, nb // 2)
            while nb > 1 and B % nb != 0:
                nb -= 1
        else:
            t = max(128, _round_up(t // 2, 128))

    return nb, t, vmem_limit


# --------------------------------------------------------------------------
# Wrapper
# --------------------------------------------------------------------------
@functools.partial(jax.jit, static_argnames=("layernorm_type",))
def layernorm_nchw(x, weight, bias=None, layernorm_type="BiasFree"):
    """tsdn.LayerNorm forward: channel-wise LayerNorm of an NCHW tensor."""
    B, C, H, W = x.shape
    HW = H * W
    x3 = x.reshape(B, C, HW)            # free, contiguous view of NCHW

    nb, t, vmem_limit = _plan_blocks(B, C, HW, x.dtype.itemsize)
    grid = (pl.cdiv(B, nb), pl.cdiv(HW, t))

    x_spec = pl.BlockSpec((nb, C, t), lambda b, j: (b, 0, j))
    p_spec = pl.BlockSpec((1, C, 1), lambda b, j: (0, 0, 0))
    out_spec = pl.BlockSpec((nb, C, t), lambda b, j: (b, 0, j))

    # Hoist the param cast / layout out of the per-tile kernel work.
    w3 = weight.astype(jnp.float32).reshape(1, C, 1)

    cp = pltpu.CompilerParams(
        dimension_semantics=("parallel", "parallel"),
        vmem_limit_bytes=vmem_limit,
    )

    if layernorm_type == "BiasFree":
        out3 = pl.pallas_call(
            _biasfree_ln_kernel,
            out_shape=jax.ShapeDtypeStruct((B, C, HW), x.dtype),
            grid=grid,
            in_specs=[x_spec, p_spec],
            out_specs=out_spec,
            compiler_params=cp,
        )(x3, w3)
    else:
        b3 = bias.astype(jnp.float32).reshape(1, C, 1)
        out3 = pl.pallas_call(
            _withbias_ln_kernel,
            out_shape=jax.ShapeDtypeStruct((B, C, HW), x.dtype),
            grid=grid,
            in_specs=[x_spec, p_spec, p_spec],
            out_specs=out_spec,
            compiler_params=cp,
        )(x3, w3, b3)

    return out3.reshape(B, C, H, W)


# --------------------------------------------------------------------------
# Pure-JAX reference (mirrors to_3d -> body -> to_4d of the PyTorch module).
# --------------------------------------------------------------------------
def _reference_layernorm_nchw(x, weight, bias=None, layernorm_type="BiasFree"):
    B, C, H, W = x.shape
    x3 = jnp.transpose(x, (0, 2, 3, 1)).reshape(B, H * W, C).astype(jnp.float32)
    mu = jnp.mean(x3, axis=-1, keepdims=True)
    var = jnp.mean((x3 - mu) ** 2, axis=-1, keepdims=True)
    inv = 1.0 / jnp.sqrt(var + EPS)
    if layernorm_type == "BiasFree":
        y = x3 * inv * weight.astype(jnp.float32)
    else:
        y = (x3 - mu) * inv * weight.astype(jnp.float32) + bias.astype(jnp.float32)
    y = y.astype(x.dtype)
    return jnp.transpose(y.reshape(B, H, W, C), (0, 3, 1, 2))


if __name__ == "__main__":
    key = jax.random.PRNGKey(0)
    B, C, H, W = 2, 4, 16, 16
    x = jax.random.normal(key, (B, C, H, W), dtype=jnp.float32)

    # Parameters as in __init__: weight = ones(dim), bias = zeros(dim).
    weight = jnp.ones((C,), dtype=jnp.float32)
    bias = jnp.zeros((C,), dtype=jnp.float32)

    # Default module config: LayerNorm(dim, LayerNorm_type='BiasFree').
    out_bf = layernorm_nchw(x, weight, layernorm_type="BiasFree")
    jax.block_until_ready(out_bf)
    ref_bf = _reference_layernorm_nchw(x, weight, layernorm_type="BiasFree")
    assert out_bf.shape == (B, C, H, W)
    assert jnp.allclose(out_bf, ref_bf, atol=1e-5, rtol=1e-5)

    # WithBias variant.
    out_wb = layernorm_nchw(x, weight, bias, layernorm_type="WithBias")
    jax.block_until_ready(out_wb)
    ref_wb = _reference_layernorm_nchw(x, weight, bias, layernorm_type="WithBias")
    assert jnp.allclose(out_wb, ref_wb, atol=1e-5, rtol=1e-5)

    # Native bf16 I/O path (no wrapper-side upcast; f32 math inside kernel).
    x_bf16 = x.astype(jnp.bfloat16)
    out_lp = layernorm_nchw(x_bf16, weight, layernorm_type="BiasFree")
    jax.block_until_ready(out_lp)
    assert out_lp.dtype == jnp.bfloat16
    ref_lp = _reference_layernorm_nchw(x_bf16, weight, layernorm_type="BiasFree")
    assert jnp.allclose(out_lp.astype(jnp.float32), ref_lp.astype(jnp.float32),
                        atol=5e-2, rtol=5e-2)

    print("KERNEL_OK")
</pallas_src>

<mosaic_0001>
module attributes {stable_mosaic.version = 11 : i64} {
  func.func @_biasfree_ln_kernel(%arg0: i32, %arg1: i32, %arg2: memref<2x4x256xf32, #tpu.memory_space<vmem>>, %arg3: memref<1x4x1xf32, #tpu.memory_space<vmem>>, %arg4: memref<2x4x256xf32, #tpu.memory_space<vmem>>) attributes {dimension_semantics = [#tpu.dimension_semantics<parallel>, #tpu.dimension_semantics<parallel>], iteration_bounds = array<i64: 1, 1>, scalar_prefetch = 0 : i64, scratch_operands = 0 : i64, tpu.core_type = #tpu.core_type<tc>, window_params = [{transform_indices = @transform_0, window_bounds = array<i64: 2, 4, 256>}, {pipeline_mode = #tpu.pipeline_mode<synchronous>, transform_indices = @transform_1, window_bounds = array<i64: 1, 4, 1>}, {transform_indices = @transform_2, window_bounds = array<i64: 2, 4, 256>}]} {
    %c0 = arith.constant 0 : index
    %c0_0 = arith.constant 0 : index
    %c0_1 = arith.constant 0 : index
    %0 = vector.load %arg2[%c0, %c0_0, %c0_1] : memref<2x4x256xf32, #tpu.memory_space<vmem>>, vector<2x4x256xf32>
    %cst = arith.constant dense<0.000000e+00> : vector<2x256xf32>
    %1 = vector.multi_reduction <add>, %0, %cst [1] : vector<2x4x256xf32> to vector<2x256xf32>
    %2 = vector.shape_cast %1 : vector<2x256xf32> to vector<2x1x256xf32>
    %cst_2 = arith.constant 4.000000e+00 : f32
    %3 = vector.broadcast %cst_2 : f32 to vector<2x1x256xf32>
    %4 = arith.divf %2, %3 : vector<2x1x256xf32>
    %5 = vector.broadcast %4 : vector<2x1x256xf32> to vector<2x4x256xf32>
    %6 = arith.subf %0, %5 : vector<2x4x256xf32>
    %7 = arith.mulf %6, %6 : vector<2x4x256xf32>
    %cst_3 = arith.constant dense<0.000000e+00> : vector<2x256xf32>
    %8 = vector.multi_reduction <add>, %7, %cst_3 [1] : vector<2x4x256xf32> to vector<2x256xf32>
    %9 = vector.shape_cast %8 : vector<2x256xf32> to vector<2x1x256xf32>
    %cst_4 = arith.constant 4.000000e+00 : f32
    %10 = vector.broadcast %cst_4 : f32 to vector<2x1x256xf32>
    %11 = arith.divf %9, %10 : vector<2x1x256xf32>
    %cst_5 = arith.constant 9.99999974E-6 : f32
    %12 = vector.broadcast %cst_5 : f32 to vector<2x1x256xf32>
    %13 = arith.addf %11, %12 : vector<2x1x256xf32>
    %14 = math.rsqrt %13 : vector<2x1x256xf32>
    %15 = vector.broadcast %14 : vector<2x1x256xf32> to vector<2x4x256xf32>
    %16 = arith.mulf %0, %15 : vector<2x4x256xf32>
    %c0_6 = arith.constant 0 : index
    %c0_7 = arith.constant 0 : index
    %c0_8 = arith.constant 0 : index
    %17 = vector.load %arg3[%c0_6, %c0_7, %c0_8] : memref<1x4x1xf32, #tpu.memory_space<vmem>>, vector<1x4x1xf32>
    %18 = vector.broadcast %17 : vector<1x4x1xf32> to vector<2x4x256xf32>
    %19 = arith.mulf %16, %18 : vector<2x4x256xf32>
    %c0_9 = arith.constant 0 : index
    %c0_10 = arith.constant 0 : index
    %c0_11 = arith.constant 0 : index
    %20 = vector.load %arg4[%c0_9, %c0_10, %c0_11] : memref<2x4x256xf32, #tpu.memory_space<vmem>>, vector<2x4x256xf32>
    tpu.vector_store %arg4[%c0_9, %c0_10, %c0_11], %19 {strides = array<i32>} : memref<2x4x256xf32, #tpu.memory_space<vmem>>, vector<2x4x256xf32>,
    return
  }
  func.func @transform_0(%arg0: i32, %arg1: i32) -> (i32, i32, i32) {
    %c0_i32 = arith.constant 0 : i32
    %c0_i32_0 = arith.constant 0 : i32
    return %arg0, %c0_i32, %arg1 : i32, i32, i32
  }
  func.func @transform_1(%arg0: i32, %arg1: i32) -> (i32, i32, i32) {
    %c0_i32 = arith.constant 0 : i32
    %c0_i32_0 = arith.constant 0 : i32
    %c0_i32_1 = arith.constant 0 : i32
    %c0_i32_2 = arith.constant 0 : i32
    return %c0_i32, %c0_i32_0, %c0_i32_1 : i32, i32, i32
  }
  func.func @transform_2(%arg0: i32, %arg1: i32) -> (i32, i32, i32) {
    %c0_i32 = arith.constant 0 : i32
    %c0_i32_0 = arith.constant 0 : i32
    return %arg0, %c0_i32, %arg1 : i32, i32, i32
  }
}

</mosaic_0001>

<bundles_post_ra>
// kernel: layernorm_nchw.1
= control target key start
LH: loop header
LB: loop body
LE: loop exit
PB: predicated region body
PF: predicated region fallthrough
CT: control target
= control target key end

     0   :  { %v213_v0 = vmov 0   ;;  %v214_v2 = vmov 4.0   ;;  %vm26_vm0 = vcmask 1043456   ;;  %s268_s1 = inlined_call_operand.vmem [shape: f32[1,4,1], index: 1, kind: input, shape index: {}]   ;;  %s269_s0 = inlined_call_operand.vmem [shape: f32[2,4,256], index: 0, kind: input, shape index: {}]   ;;  %s270_s2 = inlined_call_operand.vmem [shape: f32[2,4,256], index: 2, kind: output, shape index: {}]  }
   0x1   :  { %202 = vset.pattern.permute.xlu0 %v213_v0  ;;  %v181_v1 = vld [vmem:[%s268_s1] sm:$0xf]  ;;  %203 = vrcp.f32 %v214_v2  ;;  %v242_v4 = vld [vmem:[%s269_s0 + $0x8] sm:$0xff] }
   0x2   :  { %184 = vperm.xlu0 %202, %v181_v1   ;;  %v237_v3 = vld [vmem:[%s269_s0] sm:$0xff]  ;;  %19 = vst [vmem:[#allocation1 + $0x10] ss:$2 sm:$0xff] %v242_v4 }
   0x3   :  { %15 = vst [vmem:[#allocation1] ss:$2 sm:$0xff] %v237_v3 }
   0x7   :  { %v204_v5 = vpop.eup %203 }
   0x8   :  { %v56_v6 = vmul.f32 4.0, %v204_v5  ;;  %vm60_vm1 = vweird.f32 %v204_v5 }
   0x9   :  { %v21_v9 = vld.sshfl [vmem:[#allocation1 + $0x18] sm:$0xff pattern:$0x75316420]  ;;  %v20_v12 = vld.sshfl [vmem:[#allocation1 + $0x10] sm:$0xff pattern:$0x75316420] }
   0xa   :  { %v57_v7 = vsub.f32 1.0, %v56_v6  ;;  %v17_v8 = vld.sshfl [vmem:[#allocation1 + $0x8] sm:$0xff pattern:$0x75316420]  ;;  %v41_v15 = vsel %vm26_vm0, %v20_v12, 0.0  ;;  %v48_v16 = vsel %vm26_vm0, %v21_v9, 0.0 }
   0xb   :  { %v34_v10 = vsel %vm26_vm0, %v17_v8, 0.0  ;;  %v16_v11 = vld.sshfl [vmem:[#allocation1] sm:$0xff pattern:$0x75316420]  ;;  %v42_v19 = vrot.slane %v41_v15, 4  ;;  %v49_v20 = vrot.slane %v48_v16, 4 }
   0xc   :  { %v27_v13 = vsel %vm26_vm0, %v16_v11, 0.0  ;;  %v35_v14 = vrot.slane %v34_v10, 4  ;;  %v58_v17 = vmul.f32 %v204_v5, %v57_v7 }
   0xd   :  { %v28_v18 = vrot.slane %v27_v13, 4  ;;  %v43_v23 = vadd.f32 %v42_v19, %v41_v15  ;;  %v50_v24 = vadd.f32 %v49_v20, %v48_v16 }
   0xe   :  { %v36_v21 = vadd.f32 %v35_v14, %v34_v10  ;;  %v59_v26 = vadd.f32 %v204_v5, %v58_v17 }
   0xf   :  { %v29_v22 = vadd.f32 %v28_v18, %v27_v13  ;;  %v44_v28 = vrot.slane %v43_v23, 2  ;;  %v51_v29 = vrot.slane %v50_v24, 2 }
  0x10   :  { %v37_v25 = vrot.slane %v36_v21, 2  ;;  %v61_v35 = vsel %vm60_vm1, %v204_v5, %v59_v26 }
  0x11   :  { %v30_v27 = vrot.slane %v29_v22, 2  ;;  %v45_v32 = vadd.f32 %v44_v28, %v43_v23  ;;  %v52_v33 = vadd.f32 %v51_v29, %v50_v24 }
  0x12   :  { %v38_v30 = vadd.f32 %v37_v25, %v36_v21 }
  0x13   :  { %v31_v31 = vadd.f32 %v30_v27, %v29_v22  ;;  %v46_v37 = vrot.slane %v45_v32, 1  ;;  %v53_v38 = vrot.slane %v52_v33, 1 }
  0x14   :  { %v39_v34 = vrot.slane %v38_v30, 1 }
  0x15   :  { %v32_v36 = vrot.slane %v31_v31, 1  ;;  %v47_v41 = vadd.f32 %v46_v37, %v45_v32  ;;  %v54_v42 = vadd.f32 %v53_v38, %v52_v33 }
  0x16   :  { %v40_v39 = vadd.f32 %v39_v34, %v38_v30 }
  0x17   :  { %v33_v40 = vadd.f32 %v32_v36, %v31_v31  ;;  %v64_v45 = vmul.f32 %v61_v35, %v47_v41  ;;  %v65_v46 = vmul.f32 %v61_v35, %v54_v42 }
  0x18   :  { %v63_v43 = vmul.f32 %v61_v35, %v40_v39 }
  0x19   :  { %v62_v44 = vmul.f32 %v61_v35, %v33_v40  ;;  %v71_v48 = vrot.slane %v65_v46, 4 }
  0x1a   :  { %v70_v47 = vrot.slane %v63_v43, 4 }
  0x1b   :  { %v73_v50 = vsel %vm26_vm0, %v64_v45, %v71_v48 }
  0x1c   :  { %v72_v49 = vsel %vm26_vm0, %v62_v44, %v70_v47  ;;  %v77_v52 = vsub.f32 %v242_v4, %v73_v50 }
  0x1d   :  { %v76_v51 = vsub.f32 %v237_v3, %v72_v49 }
  0x1e   :  { %v79_v54 = vmul.f32 %v77_v52, %v77_v52 }
  0x1f   :  { %v78_v53 = vmul.f32 %v76_v51, %v76_v51 }
  0x20   :  { %86 = vst [vmem:[#allocation1 + $0x10] ss:$2 sm:$0xff] %v79_v54 }
  0x21   :  { %82 = vst [vmem:[#allocation1] ss:$2 sm:$0xff] %v78_v53 }
  0x27   :  { %v87_v57 = vld.sshfl [vmem:[#allocation1 + $0x10] sm:$0xff pattern:$0x75316420]  ;;  %v88_v58 = vld.sshfl [vmem:[#allocation1 + $0x18] sm:$0xff pattern:$0x75316420] }
  0x28   :  { %v84_v55 = vld.sshfl [vmem:[#allocation1 + $0x8] sm:$0xff pattern:$0x75316420]  ;;  %v83_v56 = vld.sshfl [vmem:[#allocation1] sm:$0xff pattern:$0x75316420] }
  0x29   :  { %v93_v59 = vsel %vm26_vm0, %v83_v56, 0.0  ;;  %v100_v60 = vsel %vm26_vm0, %v84_v55, 0.0  ;;  %v107_v61 = vsel %vm26_vm0, %v87_v57, 0.0  ;;  %v114_v1 = vsel %vm26_vm0, %v88_v58, 0.0 }
  0x2a   :  { %v94_v62 = vrot.slane %v93_v59, 4  ;;  %v101_v63 = vrot.slane %v100_v60, 4  ;;  %v108_v0 = vrot.slane %v107_v61, 4  ;;  %v115_v2 = vrot.slane %v114_v1, 4 }
  0x2c   :  { %v95_v5 = vadd.f32 %v94_v62, %v93_v59  ;;  %v102_v6 = vadd.f32 %v101_v63, %v100_v60  ;;  %v109_v7 = vadd.f32 %v108_v0, %v107_v61  ;;  %v116_v8 = vadd.f32 %v115_v2, %v114_v1 }
  0x2d   :  { %v215_v61 = vmov 839922192  }
  0x2e   :  { %v103_v9 = vrot.slane %v102_v6, 2  ;;  %v96_v10 = vrot.slane %v95_v5, 2  ;;  %v117_v11 = vrot.slane %v116_v8, 2  ;;  %v110_v13 = vrot.slane %v109_v7, 2 }
  0x2f   :  { %v187_v62 = vunpack.c.l.s4 %v215_v61 }
  0x30   :  { %v104_v12 = vadd.f32 %v103_v9, %v102_v6  ;;  %v118_v14 = vadd.f32 %v117_v11, %v116_v8  ;;  %v97_v15 = vadd.f32 %v96_v10, %v95_v5  ;;  %v111_v17 = vadd.f32 %v110_v13, %v109_v7 }
  0x31   :  { %v188_v5 = vunpack.c.0.s8 %v187_v62 }
  0x32   :  { %v105_v16 = vrot.slane %v104_v12, 1  ;;  %v119_v18 = vrot.slane %v118_v14, 1  ;;  %v98_v19 = vrot.slane %v97_v15, 1  ;;  %v112_v21 = vrot.slane %v111_v17, 1 }
  0x34   :  { %v106_v20 = vadd.f32 %v105_v16, %v104_v12  ;;  %v120_v22 = vadd.f32 %v119_v18, %v118_v14  ;;  %v99_v23 = vadd.f32 %v98_v19, %v97_v15  ;;  %v113_v25 = vadd.f32 %v112_v21, %v111_v17 }
  0x36   :  { %v122_v24 = vmul.f32 %v106_v20, %v61_v35  ;;  %v124_v26 = vmul.f32 %v120_v22, %v61_v35  ;;  %v121_v27 = vmul.f32 %v99_v23, %v61_v35  ;;  %v123_v29 = vmul.f32 %v113_v25, %v61_v35 }
  0x38   :  { %v126_v28 = vadd.f32 1e-05, %v122_v24  ;;  %v128_v30 = vadd.f32 1e-05, %v124_v26  ;;  %v125_v31 = vadd.f32 1e-05, %v121_v27 }
  0x39   :  { %v127_v32 = vadd.f32 1e-05, %v123_v29 }
  0x3a   :  { %205 = vrsqrt.f32 %v126_v28  ;;  %vm145_vm2 = vweird.f32 %v126_v28  ;;  %vm165_vm4 = vweird.f32 %v128_v30  ;;  %vm135_vm7 = vweird.f32 %v125_v31 }
  0x3b   :  { %207 = vrsqrt.f32 %v128_v30  ;;  %vm155_vm10 = vweird.f32 %v127_v32 }
  0x3c   :  { %209 = vrsqrt.f32 %v125_v31 }
  0x3d   :  { %211 = vrsqrt.f32 %v127_v32 }
  0x40   :  { %v206_v33 = vpop.eup %205 }
  0x41   :  { %v208_v34 = vpop.eup %207  ;;  %v140_v37 = vmul.f32 %v206_v33, %v126_v28  ;;  %vm146_vm3 = vweird.f32 %v206_v33 }
  0x42   :  { %v210_v36 = vpop.eup %209  ;;  %v160_v38 = vmul.f32 %v208_v34, %v128_v30  ;;  %vm166_vm5 = vweird.f32 %v208_v34  ;;  %vm147_vm6 = vmor %vm145_vm2, %vm146_vm3 }
  0x43   :  { %v212_v39 = vpop.eup %211  ;;  %v130_v40 = vmul.f32 %v210_v36, %v125_v31  ;;  %v141_v41 = vmul.f32 %v206_v33, %v140_v37  ;;  %vm136_vm8 = vweird.f32 %v210_v36  ;;  %vm167_vm9 = vmor %vm165_vm4, %vm166_vm5 }
  0x44   :  { %v150_v42 = vmul.f32 %v212_v39, %v127_v32  ;;  %v161_v43 = vmul.f32 %v208_v34, %v160_v38  ;;  %vm156_vm11 = vweird.f32 %v212_v39  ;;  %vm137_vm12 = vmor %vm135_vm7, %vm136_vm8 }
  0x45   :  { %v131_v44 = vmul.f32 %v210_v36, %v130_v40  ;;  %v142_v45 = vmul.f32 0.5, %v141_v41  ;;  %vm157_vm13 = vmor %vm155_vm10, %vm156_vm11 }
  0x46   :  { %v151_v35 = vmul.f32 %v212_v39, %v150_v42  ;;  %v162_v46 = vmul.f32 0.5, %v161_v43 }
  0x47   :  { %v132_v47 = vmul.f32 0.5, %v131_v44  ;;  %v143_v48 = vsub.f32 1.5, %v142_v45 }
  0x48   :  { %v152_v49 = vmul.f32 0.5, %v151_v35  ;;  %v163_v50 = vsub.f32 1.5, %v162_v46 }
  0x49   :  { %v133_v51 = vsub.f32 1.5, %v132_v47  ;;  %v144_v52 = vmul.f32 %v206_v33, %v143_v48 }
  0x4a   :  { %v153_v53 = vsub.f32 1.5, %v152_v49  ;;  %v164_v54 = vmul.f32 %v208_v34, %v163_v50 }
  0x4b   :  { %v134_v55 = vmul.f32 %v210_v36, %v133_v51  ;;  %v148_v56 = vsel %vm147_vm6, %v206_v33, %v144_v52 }
  0x4c   :  { %v154_v57 = vmul.f32 %v212_v39, %v153_v53  ;;  %v168_v58 = vsel %vm167_vm9, %v208_v34, %v164_v54  ;;  %v173_v59 = vrot.slane %v148_v56, 4 }
  0x4d   :  { %v174_v60 = vrot.slane %v168_v58, 4  ;;  %v138_v63 = vsel %vm137_vm12, %v210_v36, %v134_v55 }
  0x4e   :  { %v158_v0 = vsel %vm157_vm13, %v212_v39, %v154_v57  ;;  %v175_v1 = vsel %vm26_vm0, %v138_v63, %v173_v59 }
  0x4f   :  { %v176_v2 = vsel %vm26_vm0, %v158_v0, %v174_v60  ;;  %v179_v6 = vmul.f32 %v175_v1, %v237_v3 }
  0x50   :  { %v180_v7 = vmul.f32 %v176_v2, %v242_v4 }
  0x74   :  { %v185_v8 = vpop.permute.xlu0 %184 }
  0x75   :  { %v189_v9 = vperm.slane %v185_v8, %v188_v5 }
  0x77   :  { %v191_v10 = vmul.f32 %v189_v9, %v179_v6  ;;  %v192_v11 = vmul.f32 %v189_v9, %v180_v7 }
  0x79   :  { %193 = vst [vmem:[%s270_s2] sm:$0xff] %v191_v10 }
  0x7a   :  { %194 = vst [vmem:[%s270_s2 + $0x8] sm:$0xff] %v192_v11 }

</bundles_post_ra>
